<compile_context>
chip_gen: v5e
topology: v5e:2x2
jax: 0.10.0
libtpu: 0.0.40
codegen_flags: <defaults>
</compile_context>

<pallas_src>
import math

import jax
import jax.numpy as jnp
from jax.experimental import pallas as pl
from jax.experimental.pallas import tpu as pltpu


def _round_up(n, m):
    return ((n + m - 1) // m) * m


def _cdiv(a, b):
    return -(-a // b)


def dqn_mlp_kernel(x_ref, w1_ref, b1_ref, w2_ref, b2_ref, w3_ref, b3_ref, o_ref):
    """Fused 3-layer MLP on one (BT, 4) batch tile.

      x_ref : (BT, 4)  f32     w1_ref: (4, 64)  bf16   b1_ref: (1, 64) f32
      w2_ref: (64, 64) bf16    b2_ref: (1, 64)  f32
      w3_ref: (1, 64)  f32     b3_ref: (1, 1)   f32
      o_ref : (BT, 1)  f32
    """
    # --- Layer 1: Linear(4, 64) + ReLU --------------------------------------
    # K=4 underfills the MXU, but the MXU has slack (VALU is the binding slot);
    # doing this as a matmul removes the ~5 VALU broadcast-FMA passes of the
    # previous version.
    x = x_ref[...].astype(jnp.bfloat16)                     # tiny (BT, 4) cast
    h1 = jnp.dot(x, w1_ref[...], preferred_element_type=jnp.float32)
    h1 = jnp.maximum(h1 + b1_ref[...], 0.0)                 # (BT, 64) f32

    # --- Layer 2: Linear(64, 64) + ReLU (MXU, bf16 in / f32 acc) ------------
    h2 = jnp.dot(h1.astype(jnp.bfloat16), w2_ref[...],
                 preferred_element_type=jnp.float32)
    h2 = jnp.maximum(h2 + b2_ref[...], 0.0)                 # (BT, 64) f32

    # --- Layer 3: Linear(64, 1) ----------------------------------------------
    # One VPU multiply + XLU lane reduction; (BT,1) store is masked but tiny.
    out = jnp.sum(h2 * w3_ref[...], axis=-1, keepdims=True) + b3_ref[...]
    o_ref[...] = out.astype(o_ref.dtype)


def dqn_forward_pallas(x, params, *, block_b=4096):
    """DeepQNetwork forward via one pipelined Pallas call.

    x: (B, 4) float32, params as produced by init_params (w stored (in, out)).
    Returns (B, 1) float32.
    """
    B = x.shape[0]
    x = x.astype(jnp.float32)

    # --- Batch tile selection -------------------------------------------------
    B8 = _round_up(B, 8)
    BT = min(_round_up(block_b, 8), B8)
    if B8 > 256:
        # Ensure >= 2 grid steps: lets the pipeline overlap DMA/compute and
        # lets the "parallel" batch axis shard across v7x's 2 TensorCores.
        BT = min(BT, _round_up(_cdiv(B8, 2), 8))

    if BT >= B:
        # Single (small) tile: pad the few trailing rows so the block divides.
        B_run = BT
        if B_run != B:
            x = jnp.pad(x, ((0, B_run - B), (0, 0)))
    else:
        # Large batch: rely on Pallas masking of the partial last block — no
        # extra full-array pad pass over HBM.
        B_run = B
    grid_b = _cdiv(B_run, BT)

    # Weights stay in the PyTorch-equivalent (in, out) orientation.
    w1 = params["w1"].astype(jnp.bfloat16)                   # (4, 64)
    b1 = params["b1"].reshape(1, 64).astype(jnp.float32)     # (1, 64)
    w2 = params["w2"].astype(jnp.bfloat16)                   # (64, 64)
    b2 = params["b2"].reshape(1, 64).astype(jnp.float32)     # (1, 64)
    w3 = params["w3"].reshape(1, 64).astype(jnp.float32)     # (64,1) -> row
    b3 = params["b3"].reshape(1, 1).astype(jnp.float32)      # (1, 1)

    resident = lambda shape: pl.BlockSpec(shape, lambda i: (0,) * len(shape))

    flops = 2 * B_run * (4 * 64 + 64 * 64 + 64)
    bytes_accessed = (B_run * (4 * 4 + 4)                     # x in f32 + out f32
                      + (4 * 64 + 64 * 64) * 2                # bf16 weights
                      + (64 + 64 + 64 + 1) * 4)               # f32 biases + w3

    out = pl.pallas_call(
        dqn_mlp_kernel,
        out_shape=jax.ShapeDtypeStruct((B_run, 1), jnp.float32),
        grid=(grid_b,),
        in_specs=[
            pl.BlockSpec((BT, 4), lambda i: (i, 0)),          # x tiles stream
            resident((4, 64)),                                # weights/biases
            resident((1, 64)),                                # stay resident
            resident((64, 64)),
            resident((1, 64)),
            resident((1, 64)),
            resident((1, 1)),
        ],
        out_specs=pl.BlockSpec((BT, 1), lambda i: (i, 0)),
        compiler_params=pltpu.CompilerParams(
            dimension_semantics=("parallel",),
            vmem_limit_bytes=40 * 1024 * 1024,
        ),
        cost_estimate=pl.CostEstimate(
            flops=flops, transcendentals=0, bytes_accessed=bytes_accessed),
    )(x, w1, b1, w2, b2, w3, b3)

    return out[:B]                                            # (B, 1) f32


def dqn_forward_ref(x, params):
    """Pure-JAX reference, identical semantics to the PyTorch forward (f32)."""
    h1 = jnp.maximum(x @ params["w1"] + params["b1"], 0.0)
    h2 = jnp.maximum(h1 @ params["w2"] + params["b2"], 0.0)
    return h2 @ params["w3"] + params["b3"]


def xavier_uniform(key, fan_in, fan_out):
    """Matches torch.nn.init.xavier_uniform_ (gain=1)."""
    bound = math.sqrt(6.0 / (fan_in + fan_out))
    # Stored as (in, out); distribution identical to PyTorch's (out, in) layout
    # since the xavier bound is symmetric in the fans.
    return jax.random.uniform(
        key, (fan_in, fan_out), dtype=jnp.float32, minval=-bound, maxval=bound
    )


def init_params(key):
    k1, k2, k3 = jax.random.split(key, 3)
    return {
        "w1": xavier_uniform(k1, 4, 64),
        "b1": jnp.zeros((1, 64), jnp.float32),   # nn.init.constant_(bias, 0)
        "w2": xavier_uniform(k2, 64, 64),
        "b2": jnp.zeros((1, 64), jnp.float32),
        "w3": xavier_uniform(k3, 64, 1),
        "b3": jnp.zeros((1, 1), jnp.float32),
    }


if __name__ == "__main__":
    key = jax.random.PRNGKey(0)
    pkey, xkey1, xkey2 = jax.random.split(key, 3)
    params = init_params(pkey)

    # bf16 MXU operands -> compare against the f32 reference with bf16 tolerance.
    TOL = dict(atol=5e-2, rtol=5e-2)

    # Case 1: small batch (single 8-row block, grid of 1).
    B1 = 8
    x1 = jax.random.normal(xkey1, (B1, 4), dtype=jnp.float32)
    out1 = jax.block_until_ready(dqn_forward_pallas(x1, params))
    ref1 = dqn_forward_ref(x1, params)
    assert out1.shape == (B1, 1), out1.shape
    assert jnp.allclose(out1, ref1, **TOL), "mismatch vs reference (B=8)"

    # Case 2: ragged batch, multi-step pipelined 'parallel' grid with a masked
    # partial last block (block_b=128 -> grid of 3, last block 44/128 valid).
    B2 = 300
    x2 = jax.random.normal(xkey2, (B2, 4), dtype=jnp.float32)
    out2 = jax.block_until_ready(
        dqn_forward_pallas(x2, params, block_b=128)
    )
    ref2 = dqn_forward_ref(x2, params)
    assert out2.shape == (B2, 1), out2.shape
    assert jnp.allclose(out2, ref2, **TOL), "mismatch vs reference (B=300)"

    print("KERNEL_OK")
</pallas_src>

<mosaic_0001>
module attributes {stable_mosaic.version = 11 : i64} {
  func.func @dqn_mlp_kernel(%arg0: i32, %arg1: memref<8x4xf32, #tpu.memory_space<vmem>>, %arg2: memref<4x64xbf16, #tpu.memory_space<vmem>>, %arg3: memref<1x64xf32, #tpu.memory_space<vmem>>, %arg4: memref<64x64xbf16, #tpu.memory_space<vmem>>, %arg5: memref<1x64xf32, #tpu.memory_space<vmem>>, %arg6: memref<1x64xf32, #tpu.memory_space<vmem>>, %arg7: memref<1x1xf32, #tpu.memory_space<vmem>>, %arg8: memref<8x1xf32, #tpu.memory_space<vmem>>) attributes {dimension_semantics = [#tpu.dimension_semantics<parallel>], iteration_bounds = array<i64: 1>, scalar_prefetch = 0 : i64, scratch_operands = 0 : i64, tpu.core_type = #tpu.core_type<tc>, window_params = [{transform_indices = @transform_0, window_bounds = array<i64: 8, 4>}, {pipeline_mode = #tpu.pipeline_mode<synchronous>, transform_indices = @transform_1, window_bounds = array<i64: 4, 64>}, {pipeline_mode = #tpu.pipeline_mode<synchronous>, transform_indices = @transform_2, window_bounds = array<i64: 1, 64>}, {pipeline_mode = #tpu.pipeline_mode<synchronous>, transform_indices = @transform_3, window_bounds = array<i64: 64, 64>}, {pipeline_mode = #tpu.pipeline_mode<synchronous>, transform_indices = @transform_4, window_bounds = array<i64: 1, 64>}, {pipeline_mode = #tpu.pipeline_mode<synchronous>, transform_indices = @transform_5, window_bounds = array<i64: 1, 64>}, {pipeline_mode = #tpu.pipeline_mode<synchronous>, transform_indices = @transform_6, window_bounds = array<i64: 1, 1>}, {transform_indices = @transform_7, window_bounds = array<i64: 8, 1>}]} {
    %c0 = arith.constant 0 : index
    %c0_0 = arith.constant 0 : index
    %0 = vector.load %arg1[%c0, %c0_0] : memref<8x4xf32, #tpu.memory_space<vmem>>, vector<8x4xf32>
    %1 = arith.truncf %0 : vector<8x4xf32> to vector<8x4xbf16>
    %c0_1 = arith.constant 0 : index
    %c0_2 = arith.constant 0 : index
    %2 = vector.load %arg2[%c0_1, %c0_2] : memref<4x64xbf16, #tpu.memory_space<vmem>>, vector<4x64xbf16>
    %cst = arith.constant dense<0.000000e+00> : vector<8x64xf32>
    %3 = tpu.matmul %1, %2, %cst {dimension_numbers = #tpu.dot_dimension_numbers<[1], [0], [0], [1], [0, 0, 1, 1], [], []>} : vector<8x4xbf16>, vector<4x64xbf16>, vector<8x64xf32> -> vector<8x64xf32>
    %c0_3 = arith.constant 0 : index
    %c0_4 = arith.constant 0 : index
    %4 = vector.load %arg3[%c0_3, %c0_4] : memref<1x64xf32, #tpu.memory_space<vmem>>, vector<1x64xf32>
    %5 = vector.broadcast %4 : vector<1x64xf32> to vector<8x64xf32>
    %6 = arith.addf %3, %5 : vector<8x64xf32>
    %cst_5 = arith.constant 0.000000e+00 : f32
    %7 = vector.broadcast %cst_5 : f32 to vector<8x64xf32>
    %8 = arith.maximumf %6, %7 : vector<8x64xf32>
    %9 = arith.truncf %8 : vector<8x64xf32> to vector<8x64xbf16>
    %c0_6 = arith.constant 0 : index
    %c0_7 = arith.constant 0 : index
    %10 = vector.load %arg4[%c0_6, %c0_7] : memref<64x64xbf16, #tpu.memory_space<vmem>>, vector<64x64xbf16>
    %cst_8 = arith.constant dense<0.000000e+00> : vector<8x64xf32>
    %11 = tpu.matmul %9, %10, %cst_8 {dimension_numbers = #tpu.dot_dimension_numbers<[1], [0], [0], [1], [0, 0, 1, 1], [], []>} : vector<8x64xbf16>, vector<64x64xbf16>, vector<8x64xf32> -> vector<8x64xf32>
    %c0_9 = arith.constant 0 : index
    %c0_10 = arith.constant 0 : index
    %12 = vector.load %arg5[%c0_9, %c0_10] : memref<1x64xf32, #tpu.memory_space<vmem>>, vector<1x64xf32>
    %13 = vector.broadcast %12 : vector<1x64xf32> to vector<8x64xf32>
    %14 = arith.addf %11, %13 : vector<8x64xf32>
    %cst_11 = arith.constant 0.000000e+00 : f32
    %15 = vector.broadcast %cst_11 : f32 to vector<8x64xf32>
    %16 = arith.maximumf %14, %15 : vector<8x64xf32>
    %c0_12 = arith.constant 0 : index
    %c0_13 = arith.constant 0 : index
    %17 = vector.load %arg6[%c0_12, %c0_13] : memref<1x64xf32, #tpu.memory_space<vmem>>, vector<1x64xf32>
    %18 = vector.broadcast %17 : vector<1x64xf32> to vector<8x64xf32>
    %19 = arith.mulf %16, %18 : vector<8x64xf32>
    %cst_14 = arith.constant dense<0.000000e+00> : vector<8xf32>
    %20 = vector.multi_reduction <add>, %19, %cst_14 [1] : vector<8x64xf32> to vector<8xf32>
    %21 = vector.shape_cast %20 : vector<8xf32> to vector<8x1xf32>
    %c0_15 = arith.constant 0 : index
    %c0_16 = arith.constant 0 : index
    %22 = vector.load %arg7[%c0_15, %c0_16] : memref<1x1xf32, #tpu.memory_space<vmem>>, vector<1x1xf32>
    %23 = vector.broadcast %22 : vector<1x1xf32> to vector<8x1xf32>
    %24 = arith.addf %21, %23 : vector<8x1xf32>
    %c0_17 = arith.constant 0 : index
    %c0_18 = arith.constant 0 : index
    %25 = vector.load %arg8[%c0_17, %c0_18] : memref<8x1xf32, #tpu.memory_space<vmem>>, vector<8x1xf32>
    tpu.vector_store %arg8[%c0_17, %c0_18], %24 {strides = array<i32>} : memref<8x1xf32, #tpu.memory_space<vmem>>, vector<8x1xf32>,
    return
  }
  func.func @transform_0(%arg0: i32) -> (i32, i32) {
    %c0_i32 = arith.constant 0 : i32
    %c0_i32_0 = arith.constant 0 : i32
    return %arg0, %c0_i32 : i32, i32
  }
  func.func @transform_1(%arg0: i32) -> (i32, i32) {
    %c0_i32 = arith.constant 0 : i32
    %c0_i32_0 = arith.constant 0 : i32
    %c0_i32_1 = arith.constant 0 : i32
    return %c0_i32, %c0_i32_0 : i32, i32
  }
  func.func @transform_2(%arg0: i32) -> (i32, i32) {
    %c0_i32 = arith.constant 0 : i32
    %c0_i32_0 = arith.constant 0 : i32
    %c0_i32_1 = arith.constant 0 : i32
    return %c0_i32, %c0_i32_0 : i32, i32
  }
  func.func @transform_3(%arg0: i32) -> (i32, i32) {
    %c0_i32 = arith.constant 0 : i32
    %c0_i32_0 = arith.constant 0 : i32
    %c0_i32_1 = arith.constant 0 : i32
    return %c0_i32, %c0_i32_0 : i32, i32
  }
  func.func @transform_4(%arg0: i32) -> (i32, i32) {
    %c0_i32 = arith.constant 0 : i32
    %c0_i32_0 = arith.constant 0 : i32
    %c0_i32_1 = arith.constant 0 : i32
    return %c0_i32, %c0_i32_0 : i32, i32
  }
  func.func @transform_5(%arg0: i32) -> (i32, i32) {
    %c0_i32 = arith.constant 0 : i32
    %c0_i32_0 = arith.constant 0 : i32
    %c0_i32_1 = arith.constant 0 : i32
    return %c0_i32, %c0_i32_0 : i32, i32
  }
  func.func @transform_6(%arg0: i32) -> (i32, i32) {
    %c0_i32 = arith.constant 0 : i32
    %c0_i32_0 = arith.constant 0 : i32
    %c0_i32_1 = arith.constant 0 : i32
    return %c0_i32, %c0_i32_0 : i32, i32
  }
  func.func @transform_7(%arg0: i32) -> (i32, i32) {
    %c0_i32 = arith.constant 0 : i32
    %c0_i32_0 = arith.constant 0 : i32
    return %arg0, %c0_i32 : i32, i32
  }
}

</mosaic_0001>

<bundles_post_ra>
// kernel: tpu_custom_call.1
= control target key start
LH: loop header
LB: loop body
LE: loop exit
PB: predicated region body
PF: predicated region fallthrough
CT: control target
= control target key end

     0   :  { %s271_s0 = inlined_call_operand.vmem [shape: f32[8,4], index: 0, kind: input, shape index: {}]   ;;  %s272_s1 = inlined_call_operand.vmem [shape: bf16[4,64], index: 1, kind: input, shape index: {}]   ;;  %s273_s2 = inlined_call_operand.vmem [shape: f32[1,64], index: 2, kind: input, shape index: {}]   ;;  %s274_s3 = inlined_call_operand.hbm [shape: bf16[64,64], index: 3, kind: input, shape index: {}]   ;;  %s275_s4 = inlined_call_operand.vmem [shape: f32[1,64], index: 4, kind: input, shape index: {}]   ;;  %s276_s5 = inlined_call_operand.vmem [shape: f32[1,64], index: 5, kind: input, shape index: {}]   ;;  %s277_s6 = inlined_call_operand.<no memory space> [shape: f32[1,1], index: 6, kind: input, shape index: {}]   ;;  %s278_s7 = inlined_call_operand.vmem [shape: f32[8,1], index: 7, kind: output, shape index: {}]  }
   0x1   :  { %v12_v0 = vstv %s277_s6 }
   0x2   :  { %13 = vst [vmem:[#allocation2] sm:$0x1] %v12_v0 }
   0x3   :  { %14 = vsyncpa [#allocation4], 0  ;;  %s25_s28 = sshll.u32 %s274_s3, 4  ;;  %s204_s29 = smov [#allocation3]   ;;  %s26_s28 = int_to_ptr.hbm [resolvable:$true] %s25_s28 }
   0x4   :  { %s27_s30 = sshll.u32 %s204_s29, 4  ;;  %s205_s8 = smov 64   ;;  %s28_s30 = int_to_ptr.vmem [resolvable:$true] %s27_s30 }
   0x5   :  { %s206_s9 = smov 4  }
   0x6   :  { %33 = dma.hbm_to_vmem [thread:$0]  %s26_s28, 512, %s28_s30, [#allocation4], %s205_s8, %s205_s8, %s206_s9  }
   0x7   :  { %202 = dma.done.wait [#allocation4], 512  }
   0x8   :  { %203 = vsyncadd [#allocation4], 4294966784  ;;  %vm56_vm0 = vcmask 1041408   ;;  %v47_v1 = vld [vmem:[%s272_s1] sm:$0x3]  ;;  %vm52_vm1 = vcmask 31744  }
   0x9   :  { %v45_v2 = vld [vmem:[%s271_s0] sm:$0xff]  ;;  %v58_v4 = vsel %vm56_vm0, %v47_v1, 0  ;;  %v169_v6 = vld [vmem:[#allocation3 + $0x10] sm:$0xff]  ;;  %v168_v7 = vld [vmem:[#allocation3 + $0x8] sm:$0xff]  ;;  %vm111_vm2 = vcmask 523264   ;;  %vm142_vm3 = vcmask 7168  }
   0xa   :  { %v170_v3 = vld [vmem:[#allocation3 + $0x18] sm:$0xff]  ;;  %v46_v5 = vpack.c.bf16 %v45_v2, %v45_v2  ;;  %67 = vmatpush.bf16.msra.mxu0 %v58_v4  ;;  %v167_v8 = vld [vmem:[#allocation3] sm:$0xff] }
   0xb   :  { %119 = vmatpush.bf16.msra.mxu1 %v170_v3  ;;  %v174_v9 = vld [vmem:[%s273_s2] ss:$0 sm:$0xff] }
   0xc   :  { %v175_v15 = vld [vmem:[%s275_s4] ss:$0 sm:$0xff] }
   0xd   :  { %149 = vmatmul.msk.bf16.vlgmr.msra.gmra.mxu0 %vm52_vm1, %v46_v5  ;;  %v176_v18 = vld [vmem:[%s276_s5] ss:$0 sm:$0xff] }
   0xe   :  { %v177_v23 = vld [vmem:[#allocation2] ss:$0 sm:$0xff] }
   0xf   :  { %120 = vmatpush.bf16.msra.mxu1 %v169_v6 }
  0x13   :  { %121 = vmatpush.bf16.msra.mxu1 %v168_v7 }
  0x17   :  { %122 = vmatpush.bf16.msra.mxu1 %v167_v8 }
  0x8a   :  { %v69_v10 = vpop.f32.mrf.mxu0 }
  0x8b   :  { %v70_v11 = vadd.f32 %v174_v9, %v69_v10 }
  0x8d   :  { %v73_v12 = vmax.f32 %v70_v11, 0.0 }
  0x8f   :  { %v74_v13 = vpack.c.bf16 %v73_v12, %v73_v12 }
  0x91   :  { %166 = vmatmul.msk.bf16.vlgmr.msra.gmra.mxu1 %vm111_vm2, %v74_v13 }
  0x92   :  { %v71_v14 = vpop.f32.mrf.mxu0 }
 0x10e   :  { %v124_v16 = vpop.f32.mrf.mxu1 }
 0x10f   :  { %v125_v17 = vadd.f32 %v175_v15, %v124_v16 }
 0x111   :  { %v128_v19 = vmax.f32 %v125_v17, 0.0 }
 0x113   :  { %v133_v20 = vmul.f32 %v176_v18, %v128_v19 }
 0x115   :  { %v134_v21 = vsel %vm111_vm2, %v133_v20, 0.0 }
 0x116   :  { %v126_v22 = vpop.f32.mrf.mxu1  ;;  %135 = vadd.xlane.f32.xlu0 %v134_v21 }
 0x189   :  { %v136_v24 = vpop.xlane.xlu0 %135 }
 0x18a   :  { %v141_v25 = vadd.f32 %v177_v23, %v136_v24 }
 0x18c   :  { %143 = vst.msk [vmem:[%s278_s7] sm:$0xff] %vm142_vm3, %v141_v25 }
 0x18d   :  { %148 = vsyncpa [#allocation4], 1 }

</bundles_post_ra>
